<compile_context>
chip_gen: v7x
topology: tpu7x:2x2x1
jax: 0.10.0
libtpu: 0.0.40
codegen_flags: <defaults>
</compile_context>

<pallas_src>
import jax
import jax.numpy as jnp
from jax.experimental import pallas as pl
from jax.experimental.pallas import tpu as pltpu

_LANE = 128  # TPU lane width


def _regressor_kernel(w1_ref, b1_ref, w2_ref, b2_ref, w3_ref, b3_ref,
                      x_ref, o_ref):
    # x_ref: (4, TB) f32 in VMEM -- features on sublanes, batch on lanes.
    # Weights/biases are whole arrays in SMEM; everything is unrolled VPU
    # broadcast-multiply-add (MXU would be ~0% utilized at K=4/3/2).
    x = [x_ref[k:k + 1, :] for k in range(4)]            # 4 x (1, TB)

    # Layer 1: (4 -> 3) + sigmoid
    h1 = []
    for j in range(3):
        s = x[0] * w1_ref[0, j]
        for k in range(1, 4):
            s = s + x[k] * w1_ref[k, j]
        h1.append(jax.nn.sigmoid(s + b1_ref[0, j]))      # (1, TB)

    # Layer 2: (3 -> 2) + sigmoid
    h2 = []
    for j in range(2):
        s = (h1[0] * w2_ref[0, j]
             + h1[1] * w2_ref[1, j]
             + h1[2] * w2_ref[2, j])
        h2.append(jax.nn.sigmoid(s + b2_ref[0, j]))      # (1, TB)

    # Layer 3: (2 -> 1), no activation
    out = h2[0] * w3_ref[0, 0] + h2[1] * w3_ref[1, 0] + b3_ref[0, 0]
    o_ref[...] = out.astype(o_ref.dtype)                 # lane-dense (1, TB) store


def regressor_forward(x, params, *, batch_tile=1024):
    """x: (B, 4) float32. params: dict of (in,out) weights and (1,out) biases.

    Returns (B, 1) float32, matching torch's nn.Sequential forward.
    """
    B = x.shape[0]
    w1, b1 = params["w1"], params["b1"]
    w2, b2 = params["w2"], params["b2"]
    w3, b3 = params["w3"], params["b3"]

    # Lane-dense layout: batch on the lane axis, padded up to the tile size.
    lane_b = _LANE * pl.cdiv(B, _LANE)
    tb = min(batch_tile, lane_b)                  # tile (multiple of 128)
    b_pad = tb * pl.cdiv(lane_b, tb)
    xt = jnp.zeros((4, b_pad), x.dtype).at[:, :B].set(x.T)

    grid = (b_pad // tb,)
    smem = pl.BlockSpec(memory_space=pltpu.MemorySpace.SMEM)

    # ~40 flops + 5 transcendentals per batch column; traffic is x in + y out.
    cost = pl.CostEstimate(
        flops=40 * b_pad,
        transcendentals=5 * b_pad,
        bytes_accessed=4 * (4 * b_pad + b_pad) + 4 * (12 + 3 + 6 + 2 + 2 + 1),
    )

    y = pl.pallas_call(
        _regressor_kernel,
        out_shape=jax.ShapeDtypeStruct((1, b_pad), jnp.float32),
        grid=grid,
        in_specs=[smem, smem, smem, smem, smem, smem,
                  pl.BlockSpec((4, tb), lambda i: (0, i))],
        out_specs=pl.BlockSpec((1, tb), lambda i: (0, i)),
        compiler_params=pltpu.CompilerParams(
            dimension_semantics=("parallel",)),
        cost_estimate=cost,
    )(w1, b1, w2, b2, w3, b3, xt)

    return y[0, :B][:, None]                      # back to (B, 1)


def init_params(key):
    """Deterministic init mimicking torch.nn.Linear's U(-1/sqrt(fan_in), +)."""
    def linear(key, fan_in, fan_out):
        kw, kb = jax.random.split(key)
        bound = 1.0 / jnp.sqrt(fan_in)
        w = jax.random.uniform(kw, (fan_in, fan_out), jnp.float32, -bound, bound)
        b = jax.random.uniform(kb, (1, fan_out), jnp.float32, -bound, bound)
        return w, b

    k1, k2, k3 = jax.random.split(key, 3)
    w1, b1 = linear(k1, 4, 3)
    w2, b2 = linear(k2, 3, 2)
    w3, b3 = linear(k3, 2, 1)
    return {"w1": w1, "b1": b1, "w2": w2, "b2": b2, "w3": w3, "b3": b3}


def _reference(x, p):
    h1 = jax.nn.sigmoid(x @ p["w1"] + p["b1"])
    h2 = jax.nn.sigmoid(h1 @ p["w2"] + p["b2"])
    return h2 @ p["w3"] + p["b3"]


# TODO(synk): the PyTorch module's train()/SGD/MSELoss/plot_progress are host-side
# training utilities, not part of the forward pass, and are intentionally omitted.

if __name__ == "__main__":
    key = jax.random.PRNGKey(0)
    kx, kp = jax.random.split(key)
    params = init_params(kp)

    # Small primary test (single grid step).
    batch = 8
    x = jax.random.normal(kx, (batch, 4), dtype=jnp.float32)
    out = regressor_forward(x, params)
    jax.block_until_ready(out)
    ref = _reference(x, params)
    assert out.shape == (batch, 1)
    assert jnp.allclose(out, ref, atol=1e-5, rtol=1e-5)

    # Larger test: exercises the batch-tiled grid (>1 step) and lane padding.
    batch2 = 2500
    x2 = jax.random.normal(jax.random.PRNGKey(1), (batch2, 4), dtype=jnp.float32)
    out2 = regressor_forward(x2, params, batch_tile=1024)
    jax.block_until_ready(out2)
    ref2 = _reference(x2, params)
    assert out2.shape == (batch2, 1)
    assert jnp.allclose(out2, ref2, atol=1e-5, rtol=1e-5)

    print("KERNEL_OK")
</pallas_src>

<mosaic_0001>
module attributes {stable_mosaic.version = 11 : i64} {
  func.func @_regressor_kernel(%arg0: i32, %arg1: memref<4x3xf32, #tpu.memory_space<smem>>, %arg2: memref<1x3xf32, #tpu.memory_space<smem>>, %arg3: memref<3x2xf32, #tpu.memory_space<smem>>, %arg4: memref<1x2xf32, #tpu.memory_space<smem>>, %arg5: memref<2x1xf32, #tpu.memory_space<smem>>, %arg6: memref<1x1xf32, #tpu.memory_space<smem>>, %arg7: memref<4x128xf32, #tpu.memory_space<vmem>>, %arg8: memref<1x128xf32, #tpu.memory_space<vmem>>) attributes {dimension_semantics = [#tpu.dimension_semantics<parallel>], iteration_bounds = array<i64: 1>, scalar_prefetch = 0 : i64, scratch_operands = 0 : i64, tpu.core_type = #tpu.core_type<tc>, window_params = [{transform_indices = @transform_0, window_bounds = array<i64: 4, 3>}, {transform_indices = @transform_1, window_bounds = array<i64: 1, 3>}, {transform_indices = @transform_2, window_bounds = array<i64: 3, 2>}, {transform_indices = @transform_3, window_bounds = array<i64: 1, 2>}, {transform_indices = @transform_4, window_bounds = array<i64: 2, 1>}, {transform_indices = @transform_5, window_bounds = array<i64: 1, 1>}, {transform_indices = @transform_6, window_bounds = array<i64: 4, 128>}, {transform_indices = @transform_7, window_bounds = array<i64: 1, 128>}]} {
    %c0 = arith.constant 0 : index
    %c0_0 = arith.constant 0 : index
    %0 = vector.load %arg7[%c0, %c0_0] : memref<4x128xf32, #tpu.memory_space<vmem>>, vector<1x128xf32>
    %c1 = arith.constant 1 : index
    %c0_1 = arith.constant 0 : index
    %1 = vector.load %arg7[%c1, %c0_1] : memref<4x128xf32, #tpu.memory_space<vmem>>, vector<1x128xf32>
    %c2 = arith.constant 2 : index
    %c0_2 = arith.constant 0 : index
    %2 = vector.load %arg7[%c2, %c0_2] : memref<4x128xf32, #tpu.memory_space<vmem>>, vector<1x128xf32>
    %c3 = arith.constant 3 : index
    %c0_3 = arith.constant 0 : index
    %3 = vector.load %arg7[%c3, %c0_3] : memref<4x128xf32, #tpu.memory_space<vmem>>, vector<1x128xf32>
    %c0_4 = arith.constant 0 : index
    %c0_5 = arith.constant 0 : index
    %4 = memref.load %arg1[%c0_4, %c0_5] : memref<4x3xf32, #tpu.memory_space<smem>>
    %5 = vector.broadcast %4 : f32 to vector<1x128xf32>
    %6 = arith.mulf %0, %5 : vector<1x128xf32>
    %c1_6 = arith.constant 1 : index
    %c0_7 = arith.constant 0 : index
    %7 = memref.load %arg1[%c1_6, %c0_7] : memref<4x3xf32, #tpu.memory_space<smem>>
    %8 = vector.broadcast %7 : f32 to vector<1x128xf32>
    %9 = arith.mulf %1, %8 : vector<1x128xf32>
    %10 = arith.addf %6, %9 : vector<1x128xf32>
    %c2_8 = arith.constant 2 : index
    %c0_9 = arith.constant 0 : index
    %11 = memref.load %arg1[%c2_8, %c0_9] : memref<4x3xf32, #tpu.memory_space<smem>>
    %12 = vector.broadcast %11 : f32 to vector<1x128xf32>
    %13 = arith.mulf %2, %12 : vector<1x128xf32>
    %14 = arith.addf %10, %13 : vector<1x128xf32>
    %c3_10 = arith.constant 3 : index
    %c0_11 = arith.constant 0 : index
    %15 = memref.load %arg1[%c3_10, %c0_11] : memref<4x3xf32, #tpu.memory_space<smem>>
    %16 = vector.broadcast %15 : f32 to vector<1x128xf32>
    %17 = arith.mulf %3, %16 : vector<1x128xf32>
    %18 = arith.addf %14, %17 : vector<1x128xf32>
    %c0_12 = arith.constant 0 : index
    %c0_13 = arith.constant 0 : index
    %19 = memref.load %arg2[%c0_12, %c0_13] : memref<1x3xf32, #tpu.memory_space<smem>>
    %20 = vector.broadcast %19 : f32 to vector<1x128xf32>
    %21 = arith.addf %18, %20 : vector<1x128xf32>
    %22 = arith.negf %21 : vector<1x128xf32>
    %23 = math.exp %22 : vector<1x128xf32>
    %cst = arith.constant 1.000000e+00 : f32
    %24 = vector.broadcast %cst : f32 to vector<1x128xf32>
    %25 = arith.addf %24, %23 : vector<1x128xf32>
    %26 = arith.divf %24, %25 : vector<1x128xf32>
    %c0_14 = arith.constant 0 : index
    %c1_15 = arith.constant 1 : index
    %27 = memref.load %arg1[%c0_14, %c1_15] : memref<4x3xf32, #tpu.memory_space<smem>>
    %28 = vector.broadcast %27 : f32 to vector<1x128xf32>
    %29 = arith.mulf %0, %28 : vector<1x128xf32>
    %c1_16 = arith.constant 1 : index
    %c1_17 = arith.constant 1 : index
    %30 = memref.load %arg1[%c1_16, %c1_17] : memref<4x3xf32, #tpu.memory_space<smem>>
    %31 = vector.broadcast %30 : f32 to vector<1x128xf32>
    %32 = arith.mulf %1, %31 : vector<1x128xf32>
    %33 = arith.addf %29, %32 : vector<1x128xf32>
    %c2_18 = arith.constant 2 : index
    %c1_19 = arith.constant 1 : index
    %34 = memref.load %arg1[%c2_18, %c1_19] : memref<4x3xf32, #tpu.memory_space<smem>>
    %35 = vector.broadcast %34 : f32 to vector<1x128xf32>
    %36 = arith.mulf %2, %35 : vector<1x128xf32>
    %37 = arith.addf %33, %36 : vector<1x128xf32>
    %c3_20 = arith.constant 3 : index
    %c1_21 = arith.constant 1 : index
    %38 = memref.load %arg1[%c3_20, %c1_21] : memref<4x3xf32, #tpu.memory_space<smem>>
    %39 = vector.broadcast %38 : f32 to vector<1x128xf32>
    %40 = arith.mulf %3, %39 : vector<1x128xf32>
    %41 = arith.addf %37, %40 : vector<1x128xf32>
    %c0_22 = arith.constant 0 : index
    %c1_23 = arith.constant 1 : index
    %42 = memref.load %arg2[%c0_22, %c1_23] : memref<1x3xf32, #tpu.memory_space<smem>>
    %43 = vector.broadcast %42 : f32 to vector<1x128xf32>
    %44 = arith.addf %41, %43 : vector<1x128xf32>
    %45 = arith.negf %44 : vector<1x128xf32>
    %46 = math.exp %45 : vector<1x128xf32>
    %cst_24 = arith.constant 1.000000e+00 : f32
    %47 = vector.broadcast %cst_24 : f32 to vector<1x128xf32>
    %48 = arith.addf %47, %46 : vector<1x128xf32>
    %49 = arith.divf %47, %48 : vector<1x128xf32>
    %c0_25 = arith.constant 0 : index
    %c2_26 = arith.constant 2 : index
    %50 = memref.load %arg1[%c0_25, %c2_26] : memref<4x3xf32, #tpu.memory_space<smem>>
    %51 = vector.broadcast %50 : f32 to vector<1x128xf32>
    %52 = arith.mulf %0, %51 : vector<1x128xf32>
    %c1_27 = arith.constant 1 : index
    %c2_28 = arith.constant 2 : index
    %53 = memref.load %arg1[%c1_27, %c2_28] : memref<4x3xf32, #tpu.memory_space<smem>>
    %54 = vector.broadcast %53 : f32 to vector<1x128xf32>
    %55 = arith.mulf %1, %54 : vector<1x128xf32>
    %56 = arith.addf %52, %55 : vector<1x128xf32>
    %c2_29 = arith.constant 2 : index
    %c2_30 = arith.constant 2 : index
    %57 = memref.load %arg1[%c2_29, %c2_30] : memref<4x3xf32, #tpu.memory_space<smem>>
    %58 = vector.broadcast %57 : f32 to vector<1x128xf32>
    %59 = arith.mulf %2, %58 : vector<1x128xf32>
    %60 = arith.addf %56, %59 : vector<1x128xf32>
    %c3_31 = arith.constant 3 : index
    %c2_32 = arith.constant 2 : index
    %61 = memref.load %arg1[%c3_31, %c2_32] : memref<4x3xf32, #tpu.memory_space<smem>>
    %62 = vector.broadcast %61 : f32 to vector<1x128xf32>
    %63 = arith.mulf %3, %62 : vector<1x128xf32>
    %64 = arith.addf %60, %63 : vector<1x128xf32>
    %c0_33 = arith.constant 0 : index
    %c2_34 = arith.constant 2 : index
    %65 = memref.load %arg2[%c0_33, %c2_34] : memref<1x3xf32, #tpu.memory_space<smem>>
    %66 = vector.broadcast %65 : f32 to vector<1x128xf32>
    %67 = arith.addf %64, %66 : vector<1x128xf32>
    %68 = arith.negf %67 : vector<1x128xf32>
    %69 = math.exp %68 : vector<1x128xf32>
    %cst_35 = arith.constant 1.000000e+00 : f32
    %70 = vector.broadcast %cst_35 : f32 to vector<1x128xf32>
    %71 = arith.addf %70, %69 : vector<1x128xf32>
    %72 = arith.divf %70, %71 : vector<1x128xf32>
    %c0_36 = arith.constant 0 : index
    %c0_37 = arith.constant 0 : index
    %73 = memref.load %arg3[%c0_36, %c0_37] : memref<3x2xf32, #tpu.memory_space<smem>>
    %74 = vector.broadcast %73 : f32 to vector<1x128xf32>
    %75 = arith.mulf %26, %74 : vector<1x128xf32>
    %c1_38 = arith.constant 1 : index
    %c0_39 = arith.constant 0 : index
    %76 = memref.load %arg3[%c1_38, %c0_39] : memref<3x2xf32, #tpu.memory_space<smem>>
    %77 = vector.broadcast %76 : f32 to vector<1x128xf32>
    %78 = arith.mulf %49, %77 : vector<1x128xf32>
    %79 = arith.addf %75, %78 : vector<1x128xf32>
    %c2_40 = arith.constant 2 : index
    %c0_41 = arith.constant 0 : index
    %80 = memref.load %arg3[%c2_40, %c0_41] : memref<3x2xf32, #tpu.memory_space<smem>>
    %81 = vector.broadcast %80 : f32 to vector<1x128xf32>
    %82 = arith.mulf %72, %81 : vector<1x128xf32>
    %83 = arith.addf %79, %82 : vector<1x128xf32>
    %c0_42 = arith.constant 0 : index
    %c0_43 = arith.constant 0 : index
    %84 = memref.load %arg4[%c0_42, %c0_43] : memref<1x2xf32, #tpu.memory_space<smem>>
    %85 = vector.broadcast %84 : f32 to vector<1x128xf32>
    %86 = arith.addf %83, %85 : vector<1x128xf32>
    %87 = arith.negf %86 : vector<1x128xf32>
    %88 = math.exp %87 : vector<1x128xf32>
    %cst_44 = arith.constant 1.000000e+00 : f32
    %89 = vector.broadcast %cst_44 : f32 to vector<1x128xf32>
    %90 = arith.addf %89, %88 : vector<1x128xf32>
    %91 = arith.divf %89, %90 : vector<1x128xf32>
    %c0_45 = arith.constant 0 : index
    %c1_46 = arith.constant 1 : index
    %92 = memref.load %arg3[%c0_45, %c1_46] : memref<3x2xf32, #tpu.memory_space<smem>>
    %93 = vector.broadcast %92 : f32 to vector<1x128xf32>
    %94 = arith.mulf %26, %93 : vector<1x128xf32>
    %c1_47 = arith.constant 1 : index
    %c1_48 = arith.constant 1 : index
    %95 = memref.load %arg3[%c1_47, %c1_48] : memref<3x2xf32, #tpu.memory_space<smem>>
    %96 = vector.broadcast %95 : f32 to vector<1x128xf32>
    %97 = arith.mulf %49, %96 : vector<1x128xf32>
    %98 = arith.addf %94, %97 : vector<1x128xf32>
    %c2_49 = arith.constant 2 : index
    %c1_50 = arith.constant 1 : index
    %99 = memref.load %arg3[%c2_49, %c1_50] : memref<3x2xf32, #tpu.memory_space<smem>>
    %100 = vector.broadcast %99 : f32 to vector<1x128xf32>
    %101 = arith.mulf %72, %100 : vector<1x128xf32>
    %102 = arith.addf %98, %101 : vector<1x128xf32>
    %c0_51 = arith.constant 0 : index
    %c1_52 = arith.constant 1 : index
    %103 = memref.load %arg4[%c0_51, %c1_52] : memref<1x2xf32, #tpu.memory_space<smem>>
    %104 = vector.broadcast %103 : f32 to vector<1x128xf32>
    %105 = arith.addf %102, %104 : vector<1x128xf32>
    %106 = arith.negf %105 : vector<1x128xf32>
    %107 = math.exp %106 : vector<1x128xf32>
    %cst_53 = arith.constant 1.000000e+00 : f32
    %108 = vector.broadcast %cst_53 : f32 to vector<1x128xf32>
    %109 = arith.addf %108, %107 : vector<1x128xf32>
    %110 = arith.divf %108, %109 : vector<1x128xf32>
    %c0_54 = arith.constant 0 : index
    %c0_55 = arith.constant 0 : index
    %111 = memref.load %arg5[%c0_54, %c0_55] : memref<2x1xf32, #tpu.memory_space<smem>>
    %112 = vector.broadcast %111 : f32 to vector<1x128xf32>
    %113 = arith.mulf %91, %112 : vector<1x128xf32>
    %c1_56 = arith.constant 1 : index
    %c0_57 = arith.constant 0 : index
    %114 = memref.load %arg5[%c1_56, %c0_57] : memref<2x1xf32, #tpu.memory_space<smem>>
    %115 = vector.broadcast %114 : f32 to vector<1x128xf32>
    %116 = arith.mulf %110, %115 : vector<1x128xf32>
    %117 = arith.addf %113, %116 : vector<1x128xf32>
    %c0_58 = arith.constant 0 : index
    %c0_59 = arith.constant 0 : index
    %118 = memref.load %arg6[%c0_58, %c0_59] : memref<1x1xf32, #tpu.memory_space<smem>>
    %119 = vector.broadcast %118 : f32 to vector<1x128xf32>
    %120 = arith.addf %117, %119 : vector<1x128xf32>
    %c0_60 = arith.constant 0 : index
    %c0_61 = arith.constant 0 : index
    %121 = vector.load %arg8[%c0_60, %c0_61] : memref<1x128xf32, #tpu.memory_space<vmem>>, vector<1x128xf32>
    tpu.vector_store %arg8[%c0_60, %c0_61], %120 {strides = array<i32>} : memref<1x128xf32, #tpu.memory_space<vmem>>, vector<1x128xf32>,
    return
  }
  func.func @transform_0(%arg0: i32) -> (i32, i32) {
    %c0_i32 = arith.constant 0 : i32
    %c0_i32_0 = arith.constant 0 : i32
    %c0_i32_1 = arith.constant 0 : i32
    return %c0_i32, %c0_i32_0 : i32, i32
  }
  func.func @transform_1(%arg0: i32) -> (i32, i32) {
    %c0_i32 = arith.constant 0 : i32
    %c0_i32_0 = arith.constant 0 : i32
    %c0_i32_1 = arith.constant 0 : i32
    return %c0_i32, %c0_i32_0 : i32, i32
  }
  func.func @transform_2(%arg0: i32) -> (i32, i32) {
    %c0_i32 = arith.constant 0 : i32
    %c0_i32_0 = arith.constant 0 : i32
    %c0_i32_1 = arith.constant 0 : i32
    return %c0_i32, %c0_i32_0 : i32, i32
  }
  func.func @transform_3(%arg0: i32) -> (i32, i32) {
    %c0_i32 = arith.constant 0 : i32
    %c0_i32_0 = arith.constant 0 : i32
    %c0_i32_1 = arith.constant 0 : i32
    return %c0_i32, %c0_i32_0 : i32, i32
  }
  func.func @transform_4(%arg0: i32) -> (i32, i32) {
    %c0_i32 = arith.constant 0 : i32
    %c0_i32_0 = arith.constant 0 : i32
    %c0_i32_1 = arith.constant 0 : i32
    return %c0_i32, %c0_i32_0 : i32, i32
  }
  func.func @transform_5(%arg0: i32) -> (i32, i32) {
    %c0_i32 = arith.constant 0 : i32
    %c0_i32_0 = arith.constant 0 : i32
    %c0_i32_1 = arith.constant 0 : i32
    return %c0_i32, %c0_i32_0 : i32, i32
  }
  func.func @transform_6(%arg0: i32) -> (i32, i32) {
    %c0_i32 = arith.constant 0 : i32
    %c0_i32_0 = arith.constant 0 : i32
    return %c0_i32, %arg0 : i32, i32
  }
  func.func @transform_7(%arg0: i32) -> (i32, i32) {
    %c0_i32 = arith.constant 0 : i32
    %c0_i32_0 = arith.constant 0 : i32
    return %c0_i32, %arg0 : i32, i32
  }
}

</mosaic_0001>

<bundles_post_ra>
// kernel: tpu_custom_call.1
= control target key start
LH: loop header
LB: loop body
LE: loop exit
PB: predicated region body
PF: predicated region fallthrough
CT: control target
= control target key end

     0   :  { %13 = vsyncpa [#allocation5], 0  ;;  %s469_s0 = inlined_call_operand.vmem [shape: f32[4,3], index: 0, kind: input, shape index: {}]   ;;  %s470_s1 = inlined_call_operand.vmem [shape: f32[1,3], index: 1, kind: input, shape index: {}]   ;;  %s471_s2 = inlined_call_operand.vmem [shape: f32[3,2], index: 2, kind: input, shape index: {}]   ;;  %s472_s3 = inlined_call_operand.vmem [shape: f32[1,2], index: 3, kind: input, shape index: {}]   ;;  %s473_s4 = inlined_call_operand.vmem [shape: f32[2,1], index: 4, kind: input, shape index: {}]   ;;  %s474_s5 = inlined_call_operand.<no memory space> [shape: f32[1,1], index: 5, kind: input, shape index: {}]   ;;  %s475_s6 = inlined_call_operand.vmem [shape: f32[4,128], index: 6, kind: input, shape index: {}]   ;;  %s476_s7 = inlined_call_operand.hbm [shape: f32[1,128], index: 7, kind: output, shape index: {}]  }
   0x1   :  { %14 = vsyncpa [#allocation7], 0 }
   0x2   :  { %15 = vsyncpa [#allocation10], 0  ;;  %s33_s26 = sshll.u32 %s470_s1, 4  ;;  %s34_s26 = int_to_ptr.vmem [resolvable:$true] %s33_s26 }
   0x3   :  { %16 = vsyncpa [#allocation4], 0  ;;  %s53_s29 = sshll.u32 %s472_s3, 4  ;;  %s282_s30 = scalar_lea.vmem %s34_s26, 16  ;;  %s54_s29 = int_to_ptr.vmem [resolvable:$true] %s53_s29 }
   0x4   :  { %p283_p0 = scmp.ne.s32.totalorder %s34_s26, %s282_s30  ;;  %p287_p1 = scmp.lt.s32.totalorder %s34_s26, %s34_s26 }
   0x5   :  { %p288_p2 = scmp.lt.s32.totalorder %s282_s30, %s282_s30 }
   0x7   :  { %p289_p3 = por %p288_p2, %p287_p1 }
   0x9   :  { %p290_p4 = pnand %p289_p3, %p283_p0 }
   0xb   :  { %293 = shalt.err (!%p290_p4)
}
   0xc   :  { %s372_s8 = smov [#allocation6]   ;;  %s294_s9 = scalar_lea.vmem %s54_s29, 16 }
   0xd   :  { %36 = dma.vmem_to_smem %s34_s26, 16, %s372_s8, [#allocation7]  }
   0xe   :  { %p295_p5 = scmp.ne.s32.totalorder %s54_s29, %s294_s9  ;;  %p299_p6 = scmp.lt.s32.totalorder %s54_s29, %s54_s29 }
   0xf   :  { %p300_p7 = scmp.lt.s32.totalorder %s294_s9, %s294_s9 }
  0x11   :  { %p301_p8 = por %p300_p7, %p299_p6 }
  0x13   :  { %p302_p9 = pnand %p301_p8, %p295_p5 }
  0x15   :  { %305 = shalt.err (!%p302_p9)
}
  0x16   :  { %s373_s1 = smov [#allocation9]   ;;  %s23_s11 = sshll.u32 %s469_s0, 4  ;;  %s24_s11 = int_to_ptr.vmem [resolvable:$true] %s23_s11 }
  0x17   :  { %56 = dma.vmem_to_smem %s54_s29, 16, %s373_s1, [#allocation10]  }
  0x18   :  { %s43_s14 = sshll.u32 %s471_s2, 4  ;;  %s306_s15 = scalar_lea.vmem %s24_s11, 64  ;;  %s44_s14 = int_to_ptr.vmem [resolvable:$true] %s43_s14 }
  0x19   :  { %p307_p10 = scmp.ne.s32.totalorder %s24_s11, %s306_s15  ;;  %p311_p11 = scmp.lt.s32.totalorder %s24_s11, %s24_s11 }
  0x1a   :  { %p312_p12 = scmp.lt.s32.totalorder %s306_s15, %s306_s15 }
  0x1c   :  { %p313_p13 = por %p312_p12, %p311_p11 }
  0x1e   :  { %p314_p0 = pnand %p313_p13, %p307_p10 }
  0x20   :  { %317 = shalt.err (!%p314_p0)
}
  0x21   :  { %s374_s16 = smov [#allocation3]   ;;  %s318_s17 = scalar_lea.vmem %s44_s14, 64 }
  0x22   :  { %26 = dma.vmem_to_smem %s24_s11, 64, %s374_s16, [#allocation5]  }
  0x23   :  { %p319_p1 = scmp.ne.s32.totalorder %s44_s14, %s318_s17  ;;  %p323_p2 = scmp.lt.s32.totalorder %s44_s14, %s44_s14 }
  0x24   :  { %p324_p3 = scmp.lt.s32.totalorder %s318_s17, %s318_s17 }
  0x26   :  { %p325_p4 = por %p324_p3, %p323_p2 }
  0x28   :  { %p326_p5 = pnand %p325_p4, %p319_p1 }
  0x2a   :  { %329 = shalt.err (!%p326_p5)
}
  0x2b   :  { %s375_s0 = smov [#allocation8]   ;;  %s63_s19 = sshll.u32 %s473_s4, 4  ;;  %s64_s19 = int_to_ptr.vmem [resolvable:$true] %s63_s19 }
  0x2c   :  { %46 = dma.vmem_to_smem %s44_s14, 64, %s375_s0, [#allocation7]  }
  0x2d   :  { %s330_s20 = scalar_lea.vmem %s64_s19, 32  ;;  %p335_p7 = scmp.lt.s32.totalorder %s64_s19, %s64_s19 }
  0x2e   :  { %p331_p6 = scmp.ne.s32.totalorder %s64_s19, %s330_s20  ;;  %p336_p8 = scmp.lt.s32.totalorder %s330_s20, %s330_s20 }
  0x30   :  { %p337_p9 = por %p336_p8, %p335_p7 }
  0x32   :  { %p338_p10 = pnand %p337_p9, %p331_p6 }
  0x34   :  { %341 = shalt.err (!%p338_p10)
}
  0x35   :  { %s376_s21 = smov [#allocation11]  }
  0x36   :  { %66 = dma.vmem_to_smem %s64_s19, 32, %s376_s21, [#allocation10]  }
  0x37   :  { %364 = dma.done.wait [#allocation5], 64  }
  0x38   :  { %365 = vsyncadd [#allocation5], 4294967232 }
  0x39   :  { %366 = dma.done.wait [#allocation7], 80  }
  0x3a   :  { %367 = vsyncadd [#allocation7], 4294967216 }
  0x3b   :  { %368 = dma.done.wait [#allocation10], 48  }
  0x3c   :  { %369 = vsyncadd [#allocation10], 4294967248 }
  0x3d   :  { %86 = sfence }
  0x3e   :  { %s91_s22 = sld [smem:[#allocation3]]  ;;  %s235_s26 = sld [smem:[#allocation3 + $0x1]]  ;;  %v87_v0 = vld [vmem:[%s475_s6] sm:$0x1]  ;;  %v88_v1 = vld [vmem:[%s475_s6 + $0x1] sm:$0x1] }
  0x3f   :  { %s231_s23 = sld [smem:[#allocation3 + $0x80]]  ;;  %s236_s29 = sld [smem:[#allocation3 + $0x81]]  ;;  %v89_v2 = vld [vmem:[%s475_s6 + $0x2] sm:$0x1]  ;;  %v90_v3 = vld [vmem:[%s475_s6 + $0x3] sm:$0x1] }
  0x40   :  { %s232_s4 = sld [smem:[#allocation3 + $0x100]]  ;;  %s237_s30 = sld [smem:[#allocation3 + $0x101]] }
  0x41   :  { %s233_s24 = sld [smem:[#allocation3 + $0x180]]  ;;  %s238_s10 = sld [smem:[#allocation3 + $0x181]] }
  0x42   :  { %s433_s25 = sld [smem:[#allocation6]]  ;;  %s241_s13 = sld [smem:[#allocation3 + $0x2]] }
  0x43   :  { %s242_s14 = sld [smem:[#allocation3 + $0x82]]  ;;  %s449_s17 = sld [smem:[#allocation6 + $0x1]] }
  0x44   :  { %v92_v4 = vstv %s91_s22  ;;  %s243_s15 = sld [smem:[#allocation3 + $0x102]]  ;;  %v116_v12 = vstv %s235_s26  ;;  %s163_s0 = sld [smem:[#allocation8]] }
  0x45   :  { %v95_v5 = vstv %s231_s23  ;;  %s447_s16 = sld [smem:[#allocation3 + $0x182]]  ;;  %v93_v6 = vmul.f32 %v92_v4, %v87_v0  ;;  %v117_v14 = vmul.f32 %v116_v12, %v87_v0  ;;  %v119_v15 = vstv %s236_s29  ;;  %s250_s2 = sld [smem:[#allocation8 + $0x1]] }
  0x46   :  { %v96_v7 = vmul.f32 %v95_v5, %v88_v1  ;;  %v99_v8 = vstv %s232_s4  ;;  %v123_v16 = vstv %s237_s30  ;;  %s245_s6 = sld [smem:[#allocation6 + $0x2]]  ;;  %v120_v18 = vmul.f32 %v119_v15, %v88_v1  ;;  %s247_s18 = sld [smem:[#allocation8 + $0x80]] }
  0x47   :  { %v103_v9 = vstv %s233_s24  ;;  %v100_v10 = vmul.f32 %v99_v8, %v89_v2  ;;  %v124_v19 = vmul.f32 %v123_v16, %v89_v2  ;;  %v127_v20 = vstv %s238_s10  ;;  %s251_s19 = sld [smem:[#allocation8 + $0x81]]  ;;  %s248_s20 = sld [smem:[#allocation8 + $0x100]] }
  0x48   :  { %v104_v11 = vmul.f32 %v103_v9, %v90_v3  ;;  %v97_v13 = vadd.f32 %v96_v7, %v93_v6  ;;  %v107_v17 = vstv %s433_s25  ;;  %v128_v22 = vmul.f32 %v127_v20, %v90_v3  ;;  %s252_s21 = sld [smem:[#allocation8 + $0x101]]  ;;  %s174_s22 = sld [smem:[#allocation9]] }
  0x49   :  { %v140_v23 = vstv %s241_s13  ;;  %v143_v24 = vstv %s242_s14  ;;  %v121_v25 = vadd.f32 %v120_v18, %v117_v14  ;;  %v131_v36 = vstv %s449_s17  ;;  %s253_s23 = sld [smem:[#allocation9 + $0x1]]  ;;  %s203_s4 = sld [smem:[#allocation11]] }
  0x4a   :  { %v101_v21 = vadd.f32 %v100_v10, %v97_v13  ;;  %v141_v26 = vmul.f32 %v140_v23, %v87_v0  ;;  %v144_v27 = vmul.f32 %v143_v24, %v88_v1  ;;  %v147_v28 = vstv %s243_s15  ;;  %s255_s24 = sld [smem:[#allocation11 + $0x80]]  ;;  %s377_s27 = smov [#allocation12]  }
  0x4b   :  { %v148_v30 = vmul.f32 %v147_v28, %v89_v2  ;;  %v151_v31 = vstv %s447_s16  ;;  %v125_v32 = vadd.f32 %v124_v19, %v121_v25  ;;  %v164_v52 = vstv %s163_s0  ;;  %s220_s28 = sshll.u32 %s377_s27, 4  ;;  %s221_s28 = int_to_ptr.vmem [resolvable:$true] %s220_s28 }
  0x4c   :  { %v105_v29 = vadd.f32 %v104_v11, %v101_v21  ;;  %v145_v33 = vadd.f32 %v144_v27, %v141_v26  ;;  %v152_v34 = vmul.f32 %v151_v31, %v90_v3  ;;  %v155_v40 = vstv %s245_s6  ;;  %s342_s29 = scalar_lea.vmem %s221_s28, 16  ;;  %s346_s30 = scalar_lea.vmem %s221_s28, 32 }
  0x4d   :  { %v129_v37 = vadd.f32 %v128_v22, %v125_v32  ;;  %v184_v53 = vstv %s250_s2  ;;  %v167_v55 = vstv %s247_s18  ;;  %v187_v56 = vstv %s251_s19  ;;  %p343_p11 = scmp.ne.s32.totalorder %s221_s28, %s342_s29  ;;  %p347_p12 = scmp.lt.s32.totalorder %s221_s28, %s221_s28 }
  0x4e   :  { %v108_v35 = vadd.f32 %v107_v17, %v105_v29  ;;  %v149_v38 = vadd.f32 %v148_v30, %v145_v33  ;;  %v171_v60 = vstv %s248_s20  ;;  %v191_v61 = vstv %s252_s21  ;;  %p348_p13 = scmp.lt.s32.totalorder %s346_s30, %s342_s29 }
  0x4f   :  { %v132_v41 = vadd.f32 %v131_v36, %v129_v37  ;;  %v175_v5 = vstv %s174_s22  ;;  %v195_v6 = vstv %s253_s23  ;;  %v204_v17 = vstv %s203_s4 }
  0x50   :  { %v234_v39 = vmul.f32 -1.442695, %v108_v35  ;;  %v153_v42 = vadd.f32 %v152_v34, %v149_v38  ;;  %v207_v18 = vstv %s255_s24  ;;  %v211_v23 = vstv %s474_s5  ;;  %p349_p0 = por %p348_p13, %p347_p12 }
  0x51   :  { %v240_v43 = vmul.f32 -1.442695, %v132_v41 }
  0x52   :  { %262 = vpow2.f32 %v234_v39  ;;  %v156_v44 = vadd.f32 %v155_v40, %v153_v42  ;;  %p350_p1 = pnand %p349_p0, %p343_p11 }
  0x53   :  { %264 = vpow2.f32 %v240_v43 }
  0x54   :  { %v246_v45 = vmul.f32 -1.442695, %v156_v44 }
  0x56   :  { %266 = vpow2.f32 %v246_v45 }
  0x5c   :  { %v263_v46 = vpop.eup %262 }
  0x5d   :  { %v112_v47 = vadd.f32 1.0, %v263_v46  ;;  %v265_v48 = vpop.eup %264 }
  0x5e   :  { %v136_v49 = vadd.f32 1.0, %v265_v48 }
  0x5f   :  { %268 = vrcp.f32 %v112_v47 }
  0x60   :  { %v267_v50 = vpop.eup %266  ;;  %270 = vrcp.f32 %v136_v49 }
  0x61   :  { %v160_v51 = vadd.f32 1.0, %v267_v50 }
  0x63   :  { %272 = vrcp.f32 %v160_v51 }
  0x69   :  { %v269_v54 = vpop.eup %268 }
  0x6a   :  { %v165_v57 = vmul.f32 %v269_v54, %v164_v52  ;;  %v185_v58 = vmul.f32 %v269_v54, %v184_v53  ;;  %v271_v59 = vpop.eup %270 }
  0x6b   :  { %v168_v62 = vmul.f32 %v271_v59, %v167_v55  ;;  %v188_v63 = vmul.f32 %v271_v59, %v187_v56 }
  0x6d   :  { %v273_v0 = vpop.eup %272  ;;  %v169_v1 = vadd.f32 %v168_v62, %v165_v57  ;;  %v189_v3 = vadd.f32 %v188_v63, %v185_v58 }
  0x6e   :  { %v172_v2 = vmul.f32 %v273_v0, %v171_v60  ;;  %v192_v4 = vmul.f32 %v273_v0, %v191_v61 }
  0x70   :  { %v173_v7 = vadd.f32 %v172_v2, %v169_v1  ;;  %v193_v8 = vadd.f32 %v192_v4, %v189_v3 }
  0x72   :  { %v176_v9 = vadd.f32 %v175_v5, %v173_v7  ;;  %v196_v10 = vadd.f32 %v195_v6, %v193_v8 }
  0x74   :  { %v249_v11 = vmul.f32 -1.442695, %v176_v9  ;;  %v254_v12 = vmul.f32 -1.442695, %v196_v10 }
  0x76   :  { %274 = vpow2.f32 %v249_v11 }
  0x77   :  { %276 = vpow2.f32 %v254_v12 }
  0x80   :  { %v275_v13 = vpop.eup %274 }
  0x81   :  { %v277_v14 = vpop.eup %276  ;;  %v180_v15 = vadd.f32 1.0, %v275_v13 }
  0x82   :  { %v200_v16 = vadd.f32 1.0, %v277_v14 }
  0x83   :  { %278 = vrcp.f32 %v180_v15 }
  0x84   :  { %280 = vrcp.f32 %v200_v16 }
  0x8d   :  { %v279_v19 = vpop.eup %278 }
  0x8e   :  { %v281_v20 = vpop.eup %280  ;;  %v205_v21 = vmul.f32 %v279_v19, %v204_v17 }
  0x8f   :  { %v208_v22 = vmul.f32 %v281_v20, %v207_v18 }
  0x91   :  { %v209_v24 = vadd.f32 %v208_v22, %v205_v21 }
  0x93   :  { %v212_v25 = vadd.f32 %v211_v23, %v209_v24 }
  0x95   :  { %213 = vst [vmem:[#allocation12] sm:$0x1] %v212_v25 }
  0x96   :  { %353 = shalt.err (!%p350_p1)
}
  0x97   :  { %s354_s1 = scalar_lea.hbm %s476_s7, 16 }
  0x98   :  { %p355_p2 = scmp.ne.s32.totalorder %s476_s7, %s354_s1  ;;  %p358_p3 = scmp.lt.u32.totalorder %s354_s1, %s476_s7 }
  0x9a   :  { %p360_p4 = pnand %p358_p3, %p355_p2 }
  0x9c   :  { %363 = shalt.err (!%p360_p4)
}
  0x9d   :  { %223 = dma.vmem_to_hbm [thread:$0]  %s221_s28, 16, %s476_s7, [#allocation4]  }
  0x9e   :  { %370 = dma.done.wait [#allocation4], 16  }
  0x9f   :  { %371 = vsyncadd [#allocation4], 4294967280 }
  0xa0   :  { %227 = vsyncpa [#allocation4], 1 }
  0xa1   :  { %228 = vsyncpa [#allocation5], 1 }
  0xa2   :  { %229 = vsyncpa [#allocation7], 1 }
  0xa3   :  { %230 = vsyncpa [#allocation10], 1 }

</bundles_post_ra>
